<compile_context>
chip_gen: v7x
topology: tpu7x:2x2x1
jax: 0.10.0
libtpu: 0.0.40
codegen_flags: <defaults>
</compile_context>

<pallas_src>
import functools

import numpy as np
import jax
import jax.numpy as jnp
from jax.experimental import pallas as pl
from jax.experimental.pallas import tpu as pltpu


def _round_up(v: int, m: int) -> int:
    return ((v + m - 1) // m) * m


def _harmonic_kernel(freq_ref, x_ref, o_ref, *, in_channels, n_harmonic,
                     include_input):
    # freq_ref: (H, 1) f32, x_ref: (C, TN), o_ref: (out_dim, TN)
    C = in_channels
    H = n_harmonic
    CH = C * H

    x = x_ref[...].astype(jnp.float32)      # (C, TN)
    f = freq_ref[...]                       # (H, 1) f32

    # Per-channel blocks of (H, TN): lanes fully utilized, static row-slice
    # writes into o_ref (no concatenated temporaries).
    for c in range(C):
        e = x[c:c + 1, :] * f               # (H, TN): row h = x[c] * freq[h]
        o_ref[c * H:(c + 1) * H, :] = jnp.sin(e).astype(o_ref.dtype)
        o_ref[CH + c * H:CH + (c + 1) * H, :] = jnp.cos(e).astype(o_ref.dtype)

    if include_input:
        o_ref[2 * CH:2 * CH + C, :] = x.astype(o_ref.dtype)


def harmonic_embedding(
    x,
    in_channels: int = 3,
    n_harmonic_functions: int = 6,
    omega0: float = 1.0,
    logspace: bool = True,
    include_input: bool = True,
    tile_n: int = 2048,
):
    """Pallas TPU implementation of HarmonicEmbedding.forward.

    x: (..., in_channels) float array. Returns (..., output_dim).
    """
    assert x.shape[-1] == in_channels

    # Frequencies built host-side with numpy (no device round-trip at trace
    # time), passed to the kernel as a tiny (H, 1) input array.
    if logspace:
        freqs_np = 2.0 ** np.arange(n_harmonic_functions, dtype=np.float32)
    else:
        freqs_np = np.linspace(1.0, 2.0 ** (n_harmonic_functions - 1),
                               n_harmonic_functions, dtype=np.float32)
    freqs_np = (omega0 * freqs_np).astype(np.float32)
    freqs = jnp.asarray(freqs_np).reshape(n_harmonic_functions, 1)

    output_dim = 2 * n_harmonic_functions * in_channels
    if include_input:
        output_dim += in_channels

    leading = x.shape[:-1]
    n = 1
    for d in leading:
        n *= d
    x2 = x.reshape(n, in_channels)

    # Lane-dense layout: points on the lane (last) axis.
    xt = x2.T                                # (C, N)

    # Tile along N: large tiles amortize per-step pipeline overhead; clamp to
    # the (128-padded) problem size so tiny inputs don't over-pad.
    tile = min(_round_up(max(tile_n, 128), 128), _round_up(max(n, 1), 128))
    n_total = _round_up(max(n, 1), tile)
    if n_total != n:
        xt = jnp.pad(xt, ((0, 0), (0, n_total - n)))
    grid = (n_total // tile,)

    kernel = functools.partial(
        _harmonic_kernel,
        in_channels=in_channels,
        n_harmonic=n_harmonic_functions,
        include_input=include_input,
    )

    out_t = pl.pallas_call(
        kernel,
        out_shape=jax.ShapeDtypeStruct((output_dim, n_total), x.dtype),
        grid_spec=pltpu.PrefetchScalarGridSpec(
            num_scalar_prefetch=0,
            grid=grid,
            in_specs=[
                # Frequency table: whole (H, 1) array every step.
                pl.BlockSpec((n_harmonic_functions, 1), lambda i: (0, 0)),
                # Input points: (C, tile) lane-dense slab.
                pl.BlockSpec((in_channels, tile), lambda i: (0, i)),
            ],
            out_specs=pl.BlockSpec((output_dim, tile), lambda i: (0, i)),
        ),
        compiler_params=pltpu.CompilerParams(
            dimension_semantics=("parallel",)),
    )(freqs, xt)

    out2 = out_t[:, :n].T                    # (N, out_dim)
    return out2.reshape(*leading, output_dim)


def _reference(x, n_harmonic_functions=6, omega0=1.0, logspace=True,
               include_input=True):
    if logspace:
        freqs = 2.0 ** jnp.arange(n_harmonic_functions, dtype=jnp.float32)
    else:
        freqs = jnp.linspace(1.0, 2.0 ** (n_harmonic_functions - 1),
                             n_harmonic_functions, dtype=jnp.float32)
    freqs = omega0 * freqs
    embed = (x[..., None] * freqs).reshape(*x.shape[:-1], -1)
    parts = [jnp.sin(embed), jnp.cos(embed)]
    if include_input:
        parts.append(x)
    return jnp.concatenate(parts, axis=-1)


if __name__ == "__main__":
    key = jax.random.PRNGKey(0)
    # x: batch of 3-D coordinates, shape (2, 16, 3)
    x = jax.random.normal(key, (2, 16, 3), dtype=jnp.float32)

    out = harmonic_embedding(x, in_channels=3, n_harmonic_functions=6,
                             omega0=1.0, logspace=True, include_input=True)
    out = jax.block_until_ready(out)

    ref = _reference(x)
    assert out.shape == (2, 16, 39), out.shape
    assert jnp.allclose(out, ref, atol=1e-5, rtol=1e-5), "mismatch vs reference"

    # Also check the include_input=False path.
    out2 = harmonic_embedding(x, in_channels=3, n_harmonic_functions=6,
                              omega0=1.0, logspace=True, include_input=False)
    out2 = jax.block_until_ready(out2)
    ref2 = _reference(x, include_input=False)
    assert out2.shape == (2, 16, 36), out2.shape
    assert jnp.allclose(out2, ref2, atol=1e-5, rtol=1e-5), "mismatch (no input)"

    print("KERNEL_OK")
</pallas_src>

<mosaic_0001>
module attributes {stable_mosaic.version = 11 : i64} {
  func.func @_harmonic_kernel(%arg0: i32, %arg1: memref<6x1xf32, #tpu.memory_space<vmem>>, %arg2: memref<3x128xf32, #tpu.memory_space<vmem>>, %arg3: memref<39x128xf32, #tpu.memory_space<vmem>>) attributes {dimension_semantics = [#tpu.dimension_semantics<parallel>], iteration_bounds = array<i64: 1>, scalar_prefetch = 0 : i64, scratch_operands = 0 : i64, tpu.core_type = #tpu.core_type<tc>, window_params = [{pipeline_mode = #tpu.pipeline_mode<synchronous>, transform_indices = @transform_0, window_bounds = array<i64: 6, 1>}, {transform_indices = @transform_1, window_bounds = array<i64: 3, 128>}, {transform_indices = @transform_2, window_bounds = array<i64: 39, 128>}]} {
    %c0 = arith.constant 0 : index
    %c0_0 = arith.constant 0 : index
    %0 = vector.load %arg2[%c0, %c0_0] : memref<3x128xf32, #tpu.memory_space<vmem>>, vector<3x128xf32>
    %c0_1 = arith.constant 0 : index
    %c0_2 = arith.constant 0 : index
    %1 = vector.load %arg1[%c0_1, %c0_2] : memref<6x1xf32, #tpu.memory_space<vmem>>, vector<6x1xf32>
    %2 = vector.extract_strided_slice %0 {offsets = [0, 0], sizes = [1, 128], strides = [1, 1]} : vector<3x128xf32> to vector<1x128xf32>
    %3 = vector.broadcast %2 : vector<1x128xf32> to vector<6x128xf32>
    %4 = vector.broadcast %1 : vector<6x1xf32> to vector<6x128xf32>
    %5 = arith.mulf %3, %4 : vector<6x128xf32>
    %6 = math.sin %5 : vector<6x128xf32>
    %c0_3 = arith.constant 0 : index
    %c0_4 = arith.constant 0 : index
    %7 = vector.load %arg3[%c0_3, %c0_4] : memref<39x128xf32, #tpu.memory_space<vmem>>, vector<6x128xf32>
    tpu.vector_store %arg3[%c0_3, %c0_4], %6 {strides = array<i32>} : memref<39x128xf32, #tpu.memory_space<vmem>>, vector<6x128xf32>,
    %8 = math.cos %5 : vector<6x128xf32>
    %c18 = arith.constant 18 : index
    %c0_5 = arith.constant 0 : index
    %9 = vector.load %arg3[%c18, %c0_5] : memref<39x128xf32, #tpu.memory_space<vmem>>, vector<6x128xf32>
    tpu.vector_store %arg3[%c18, %c0_5], %8 {strides = array<i32>} : memref<39x128xf32, #tpu.memory_space<vmem>>, vector<6x128xf32>,
    %10 = vector.extract_strided_slice %0 {offsets = [1, 0], sizes = [1, 128], strides = [1, 1]} : vector<3x128xf32> to vector<1x128xf32>
    %11 = vector.broadcast %10 : vector<1x128xf32> to vector<6x128xf32>
    %12 = vector.broadcast %1 : vector<6x1xf32> to vector<6x128xf32>
    %13 = arith.mulf %11, %12 : vector<6x128xf32>
    %14 = math.sin %13 : vector<6x128xf32>
    %c6 = arith.constant 6 : index
    %c0_6 = arith.constant 0 : index
    %15 = vector.load %arg3[%c6, %c0_6] : memref<39x128xf32, #tpu.memory_space<vmem>>, vector<6x128xf32>
    tpu.vector_store %arg3[%c6, %c0_6], %14 {strides = array<i32>} : memref<39x128xf32, #tpu.memory_space<vmem>>, vector<6x128xf32>,
    %16 = math.cos %13 : vector<6x128xf32>
    %c24 = arith.constant 24 : index
    %c0_7 = arith.constant 0 : index
    %17 = vector.load %arg3[%c24, %c0_7] : memref<39x128xf32, #tpu.memory_space<vmem>>, vector<6x128xf32>
    tpu.vector_store %arg3[%c24, %c0_7], %16 {strides = array<i32>} : memref<39x128xf32, #tpu.memory_space<vmem>>, vector<6x128xf32>,
    %18 = vector.extract_strided_slice %0 {offsets = [2, 0], sizes = [1, 128], strides = [1, 1]} : vector<3x128xf32> to vector<1x128xf32>
    %19 = vector.broadcast %18 : vector<1x128xf32> to vector<6x128xf32>
    %20 = vector.broadcast %1 : vector<6x1xf32> to vector<6x128xf32>
    %21 = arith.mulf %19, %20 : vector<6x128xf32>
    %22 = math.sin %21 : vector<6x128xf32>
    %c12 = arith.constant 12 : index
    %c0_8 = arith.constant 0 : index
    %23 = vector.load %arg3[%c12, %c0_8] : memref<39x128xf32, #tpu.memory_space<vmem>>, vector<6x128xf32>
    tpu.vector_store %arg3[%c12, %c0_8], %22 {strides = array<i32>} : memref<39x128xf32, #tpu.memory_space<vmem>>, vector<6x128xf32>,
    %24 = math.cos %21 : vector<6x128xf32>
    %c30 = arith.constant 30 : index
    %c0_9 = arith.constant 0 : index
    %25 = vector.load %arg3[%c30, %c0_9] : memref<39x128xf32, #tpu.memory_space<vmem>>, vector<6x128xf32>
    tpu.vector_store %arg3[%c30, %c0_9], %24 {strides = array<i32>} : memref<39x128xf32, #tpu.memory_space<vmem>>, vector<6x128xf32>,
    %c36 = arith.constant 36 : index
    %c0_10 = arith.constant 0 : index
    %26 = vector.load %arg3[%c36, %c0_10] : memref<39x128xf32, #tpu.memory_space<vmem>>, vector<3x128xf32>
    tpu.vector_store %arg3[%c36, %c0_10], %0 {strides = array<i32>} : memref<39x128xf32, #tpu.memory_space<vmem>>, vector<3x128xf32>,
    return
  }
  func.func @transform_0(%arg0: i32) -> (i32, i32) {
    %c0_i32 = arith.constant 0 : i32
    %c0_i32_0 = arith.constant 0 : i32
    %c0_i32_1 = arith.constant 0 : i32
    return %c0_i32, %c0_i32_0 : i32, i32
  }
  func.func @transform_1(%arg0: i32) -> (i32, i32) {
    %c0_i32 = arith.constant 0 : i32
    %c0_i32_0 = arith.constant 0 : i32
    return %c0_i32, %arg0 : i32, i32
  }
  func.func @transform_2(%arg0: i32) -> (i32, i32) {
    %c0_i32 = arith.constant 0 : i32
    %c0_i32_0 = arith.constant 0 : i32
    return %c0_i32, %arg0 : i32, i32
  }
}

</mosaic_0001>

<bundles_post_ra>
// kernel: tpu_custom_call.1
= control target key start
LH: loop header
LB: loop body
LE: loop exit
PB: predicated region body
PF: predicated region fallthrough
CT: control target
= control target key end

     0   :  { %s968_s0 = inlined_call_operand.vmem [shape: f32[6,1], index: 0, kind: input, shape index: {}]   ;;  %s969_s1 = inlined_call_operand.vmem [shape: f32[3,128], index: 1, kind: input, shape index: {}]   ;;  %s970_s2 = inlined_call_operand.hbm [shape: f32[39,128], index: 2, kind: output, shape index: {}]  }
   0x1   :  { %v13_v0 = vld [vmem:[%s968_s0] sm:$0x3f] }
   0x2   :  { %7 = vsyncpa [#allocation3], 0  ;;  %v761_v1 = vmov 0   ;;  %v12_v2 = vld [vmem:[%s969_s1] sm:$0x7]  ;;  %v14_v3 = vlaneseq  ;;  %s768_s0 = smov [#allocation2]  }
   0x3   :  { %724 = vset.pattern.permute.xlu0 %v761_v1  ;;  %661 = vst [vmem:[#allocation2 + $0x24] sm:$0x7] %v12_v2  ;;  %v762_v41 = vmov 683565275   ;;  %v763_v45 = vmov 2475754826  }
   0x4   :  { %20 = vperm.xlu0 %724, %v13_v0   ;;  %v15_v4 = vshrl.u32 %v14_v3, 7  ;;  %v764_v47 = vmov 2131351028   ;;  %v765_v49 = vmov 2102212464   ;;  %s667_s1 = sshll.u32 %s768_s0, 4  ;;  %s668_s1 = int_to_ptr.vmem [resolvable:$true] %s667_s1 }
   0x5   :  { %v766_v51 = vmov 920167782   ;;  %v767_v58 = vmov 1326507024   ;;  %s737_s13 = scalar_lea.vmem %s668_s1, 640  ;;  %p742_p1 = scmp.lt.s32.totalorder %s668_s1, %s668_s1 }
   0x6   :  { %v16_v5 = vsub.s32 0, %v15_v4  ;;  %v235_v6 = vsub.s32 1, %v15_v4  ;;  %v449_v7 = vsub.s32 2, %v15_v4  ;;  %p738_p0 = scmp.ne.s32.totalorder %s668_s1, %s737_s13  ;;  %p743_p2 = scmp.lt.s32.totalorder %s737_s13, %s737_s13 }
   0x8   :  { %v17_v8 = vrot.slane %v12_v2, %v16_v5  ;;  %v236_v9 = vrot.slane %v12_v2, %v235_v6  ;;  %v450_v10 = vrot.slane %v12_v2, %v449_v7  ;;  %p744_p3 = por %p743_p2, %p742_p1 }
   0xa   :  { %p745_p4 = pnand %p744_p3, %p738_p0 }
  0x83   :  { %v21_v11 = vpop.permute.xlu0 %20 }
  0x84   :  { %v792_v12 = vmul.f32 %v21_v11, %v17_v8  ;;  %v794_v13 = vmul.f32 %v236_v9, %v21_v11  ;;  %v796_v14 = vmul.f32 %v450_v10, %v21_v11 }
  0x86   :  { %v24_v15 = vand.u32 2147483647, %v792_v12  ;;  %v27_v16 = vand.u32 2139095040, %v792_v12  ;;  %v238_v17 = vand.u32 2147483647, %v794_v13  ;;  %v241_v18 = vand.u32 2139095040, %v794_v13 }
  0x87   :  { %v455_v23 = vand.u32 2139095040, %v796_v14  ;;  %v452_v38 = vand.u32 2147483647, %v796_v14 }
  0x88   :  { %v28_v19 = vshrl.u32 %v27_v16, 23  ;;  %v31_v20 = vand.u32 8388607, %v24_v15  ;;  %v242_v21 = vshrl.u32 %v241_v18, 23  ;;  %v245_v22 = vand.u32 8388607, %v238_v17 }
  0x89   :  { %v456_v26 = vshrl.u32 %v455_v23, 23 }
  0x8a   :  { %v678_v24 = vadd.s32 4294967169, %v28_v19  ;;  %v686_v25 = vadd.s32 4294967169, %v242_v21  ;;  %v32_v28 = vor.u32 8388608, %v31_v20  ;;  %v246_v29 = vor.u32 8388608, %v245_v22 }
  0x8b   :  { %v694_v31 = vadd.s32 4294967169, %v456_v26 }
  0x8c   :  { %v34_v27 = vadd.s32 1, %v678_v24  ;;  %v248_v30 = vadd.s32 1, %v686_v25  ;;  %v807_v36 = vshll.u32 %v32_v28, 8  ;;  %v809_v37 = vshll.u32 %v246_v29, 8 }
  0x8d   :  { %v812_v39 = vadd.s32 1, %v694_v31 }
  0x8e   :  { %vm35_vm0 = vcmp.gt.s32.totalorder %v34_v27, 0  ;;  %vm249_vm1 = vcmp.gt.s32.totalorder %v248_v30, 0 }
  0x8f   :  { %v36_v32 = vsel %vm35_vm0, %v34_v27, 0  ;;  %v250_v35 = vsel %vm249_vm1, %v248_v30, 0  ;;  %vm463_vm6 = vcmp.gt.s32.totalorder %v812_v39, 0 }
  0x90   :  { %v37_v33 = vshrl.u32 %v36_v32, 5  ;;  %v38_v34 = vand.u32 31, %v36_v32  ;;  %v815_v43 = vshrl.u32 %v250_v35, 5  ;;  %v252_v44 = vand.u32 31, %v250_v35 }
  0x92   :  { %v39_v40 = vsub.s32 32, %v38_v34  ;;  %v41_v42 = vshll.u32 %v762_v41, %v38_v34  ;;  %v44_v46 = vshll.u32 %v763_v45, %v38_v34  ;;  %v47_v48 = vshll.u32 %v764_v47, %v38_v34 }
  0x93   :  { %v50_v50 = vshll.u32 %v765_v49, %v38_v34  ;;  %v53_v52 = vshll.u32 %v766_v51, %v38_v34  ;;  %vm56_vm2 = vcmp.lt.s32.totalorder %v37_v33, 1  ;;  %vm57_vm3 = vcmp.lt.s32.totalorder %v37_v33, 2 }
  0x94   :  { %v42_v53 = vshrl.u32 %v763_v45, %v39_v40  ;;  %v45_v54 = vshrl.u32 %v764_v47, %v39_v40  ;;  %v48_v55 = vshrl.u32 %v765_v49, %v39_v40  ;;  %v40_v56 = vshrl.u32 %v762_v41, %v39_v40 }
  0x95   :  { %v51_v57 = vshrl.u32 %v766_v51, %v39_v40  ;;  %v54_v59 = vshrl.u32 %v767_v58, %v39_v40  ;;  %v253_v63 = vsub.s32 32, %v252_v44  ;;  %vm58_vm4 = vcmp.lt.s32.totalorder %v37_v33, 3 }
  0x96   :  { %v43_v60 = vor.u32 %v42_v53, %v41_v42  ;;  %v46_v61 = vor.u32 %v45_v54, %v44_v46  ;;  %v49_v62 = vor.u32 %v48_v55, %v47_v48  ;;  %vm59_vm5 = vcmp.lt.s32.totalorder %v37_v33, 4 }
  0x97   :  { %v52_v0 = vor.u32 %v51_v57, %v50_v50  ;;  %v55_v1 = vor.u32 %v54_v59, %v53_v52  ;;  %v255_v9 = vshll.u32 %v762_v41, %v252_v44  ;;  %v256_v16 = vshrl.u32 %v763_v45, %v253_v63 }
  0x98   :  { %v60_v2 = vsel %vm56_vm2, %v40_v56, %v43_v60  ;;  %v61_v3 = vsel %vm59_vm5, %v49_v62, 2102212464  ;;  %v64_v4 = vsel %vm56_vm2, %v43_v60, %v46_v61  ;;  %v68_v5 = vsel %vm56_vm2, %v46_v61, %v49_v62 }
  0x99   :  { %v62_v6 = vsel %vm58_vm4, %v46_v61, %v61_v3  ;;  %v65_v7 = vsel %vm59_vm5, %v52_v0, 920167782  ;;  %v69_v8 = vsel %vm59_vm5, %v55_v1, 1326507024  ;;  %v258_v18 = vshll.u32 %v763_v45, %v252_v44 }
  0x9a   :  { %v66_v10 = vsel %vm58_vm4, %v49_v62, %v65_v7  ;;  %v70_v11 = vsel %vm58_vm4, %v52_v0, %v69_v8  ;;  %v63_v19 = vsel %vm57_vm3, %v60_v2, %v62_v6  ;;  %v259_v22 = vshrl.u32 %v764_v47, %v253_v63 }
  0x9b   :  { %v67_v20 = vsel %vm57_vm3, %v64_v4, %v66_v10  ;;  %v71_v21 = vsel %vm57_vm3, %v68_v5, %v70_v11  ;;  %v257_v27 = vor.u32 %v256_v16, %v255_v9  ;;  %v261_v29 = vshll.u32 %v764_v47, %v252_v44 }
  0x9c   :  { %v838_v23 = vmul.u32.u64.low %v807_v36, %v71_v21  ;;  %v839_v24 = vmul.u32.u64.high %v807_v36, %v71_v21, %v838_v23  ;;  %v842_v25 = vmul.u32.u64.low %v807_v36, %v67_v20  ;;  %v843_v26 = vmul.u32.u64.high %v807_v36, %v67_v20, %v842_v25 }
  0x9d   :  { %v260_v28 = vor.u32 %v259_v22, %v258_v18  ;;  %v262_v30 = vshrl.u32 %v765_v49, %v253_v63  ;;  %v264_v31 = vshll.u32 %v765_v49, %v252_v44  ;;  %v265_v32 = vshrl.u32 %v766_v51, %v253_v63 }
  0x9e   :  { %v268_v33 = vshrl.u32 %v767_v58, %v253_v63  ;;  %v79_v34 = vmul.u32 %v807_v36, %v63_v19  ;;  %v254_v35 = vshrl.u32 %v762_v41, %v253_v63  ;;  %v267_v42 = vshll.u32 %v766_v51, %v252_v44 }
  0x9f   :  { %v263_v40 = vor.u32 %v262_v30, %v261_v29  ;;  %vm81_vm7 = vc.u32 %v839_v24, %v842_v25  ;;  %v82_v46 = vadd.s32 1, %v843_v26  ;;  %v266_v48 = vor.u32 %v265_v32, %v264_v31 }
  0xa0   :  { %vm270_vm8 = vcmp.lt.s32.totalorder %v815_v43, 1  ;;  %v269_v50 = vor.u32 %v268_v33, %v267_v42  ;;  %vm272_vm9 = vcmp.lt.s32.totalorder %v815_v43, 3  ;;  %vm273_vm10 = vcmp.lt.s32.totalorder %v815_v43, 4 }
  0xa1   :  { %v278_v52 = vsel %vm270_vm8, %v257_v27, %v260_v28  ;;  %v83_v36 = vsel %vm81_vm7, %v82_v46, %v843_v26  ;;  %v275_v53 = vsel %vm273_vm10, %v263_v40, 2102212464  ;;  %v279_v54 = vsel %vm273_vm10, %v266_v48, 920167782 }
  0xa2   :  { %v282_v55 = vsel %vm270_vm8, %v260_v28, %v263_v40  ;;  %v84_v44 = vadd.s32 %v83_v36, %v79_v34  ;;  %vm271_vm11 = vcmp.lt.s32.totalorder %v815_v43, 2  ;;  %v280_v56 = vsel %vm272_vm9, %v263_v40, %v279_v54 }
  0xa3   :  { %v283_v57 = vsel %vm273_vm10, %v269_v50, 1326507024  ;;  %v274_v59 = vsel %vm270_vm8, %v254_v35, %v257_v27  ;;  %v276_v60 = vsel %vm272_vm9, %v260_v28, %v275_v53  ;;  %v281_v61 = vsel %vm271_vm11, %v278_v52, %v280_v56 }
  0xa4   :  { %v284_v62 = vsel %vm272_vm9, %v266_v48, %v283_v57  ;;  %v85_v63 = vadd.s32 536870912, %v84_v44  ;;  %v864_v1 = vmul.u32.u64.low %v809_v37, %v281_v61  ;;  %v865_v2 = vmul.u32.u64.high %v809_v37, %v281_v61, %v864_v1 }
  0xa5   :  { %v285_v0 = vsel %vm271_vm11, %v282_v55, %v284_v62  ;;  %v464_v43 = vsel %vm463_vm6, %v812_v39, 0  ;;  %v277_v6 = vsel %vm271_vm11, %v274_v59, %v276_v60  ;;  %v459_v9 = vand.u32 8388607, %v452_v38 }
  0xa6   :  { %v869_v3 = vmul.u32.u64.low %v809_v37, %v285_v0  ;;  %v870_v4 = vmul.u32.u64.high %v809_v37, %v285_v0, %v869_v3  ;;  %v875_v5 = vshrl.u32 %v85_v63, 30  ;;  %v296_v8 = vadd.s32 1, %v865_v2 }
  0xa7   :  { %v466_v10 = vand.u32 31, %v464_v43  ;;  %v293_v11 = vmul.u32 %v809_v37, %v277_v6  ;;  %v460_v20 = vor.u32 8388608, %v459_v9  ;;  %v465_v31 = vshrl.u32 %v464_v43, 5 }
  0xa8   :  { %v87_v7 = vshll.u32 %v875_v5, 30  ;;  %vm295_vm12 = vc.u32 %v870_v4, %v864_v1  ;;  %v80_v46 = vadd.s32 %v842_v25, %v839_v24  ;;  %vm26_vm4 = vcmp.lt.s32.totalorder %v792_v12, 0 }
  0xa9   :  { %v297_v18 = vsel %vm295_vm12, %v296_v8, %v865_v2  ;;  %v467_v21 = vsub.s32 32, %v466_v10  ;;  %v889_v37 = vshll.u32 %v460_v20, 8  ;;  %v469_v35 = vshll.u32 %v762_v41, %v466_v10 }
  0xaa   :  { %v88_v16 = vsub.s32 %v84_v44, %v87_v7  ;;  %v298_v39 = vadd.s32 %v297_v18, %v293_v11  ;;  %v472_v40 = vshll.u32 %v763_v45, %v466_v10  ;;  %v478_v42 = vshll.u32 %v765_v49, %v466_v10 }
  0xab   :  { %v470_v28 = vshrl.u32 %v763_v45, %v467_v21  ;;  %v473_v29 = vshrl.u32 %v764_v47, %v467_v21  ;;  %v476_v32 = vshrl.u32 %v765_v49, %v467_v21  ;;  %v479_v33 = vshrl.u32 %v766_v51, %v467_v21 }
  0xac   :  { %v90_v19 = vsub.s32 0, %v88_v16  ;;  %v299_v22 = vadd.s32 536870912, %v298_v39  ;;  %v475_v50 = vshll.u32 %v764_v47, %v466_v10  ;;  %v482_v52 = vshrl.u32 %v767_v58, %v467_v21 }
  0xad   :  { %v471_v36 = vor.u32 %v470_v28, %v469_v35  ;;  %v474_v53 = vor.u32 %v473_v29, %v472_v40  ;;  %v480_v54 = vor.u32 %v479_v33, %v478_v42  ;;  %v481_v57 = vshll.u32 %v766_v51, %v466_v10 }
  0xae   :  { %v679_v23 = vmin.u32 %v90_v19, %v88_v16  ;;  %v885_v26 = vshrl.u32 %v299_v22, 30  ;;  %v477_v56 = vor.u32 %v476_v32, %v475_v50  ;;  %vm484_vm14 = vcmp.lt.s32.totalorder %v465_v31, 1 }
  0xaf   :  { %vm485_vm15 = vcmp.lt.s32.totalorder %v465_v31, 2  ;;  %v483_v25 = vor.u32 %v482_v52, %v481_v57  ;;  %vm487_vm0 = vcmp.lt.s32.totalorder %v465_v31, 4  ;;  %v492_v58 = vsel %vm484_vm14, %v471_v36, %v474_v53 }
  0xb0   :  { %v92_v27 = vclz %v679_v23  ;;  %v301_v30 = vshll.u32 %v885_v26, 30  ;;  %v493_v61 = vsel %vm487_vm0, %v480_v54, 920167782  ;;  %v468_v63 = vshrl.u32 %v762_v41, %v467_v21 }
  0xb1   :  { %vm486_vm1 = vcmp.lt.s32.totalorder %v465_v31, 3  ;;  %v489_v51 = vsel %vm487_vm0, %v477_v56, 2102212464  ;;  %v496_v43 = vsel %vm484_vm14, %v474_v53, %v477_v56  ;;  %v497_v9 = vsel %vm487_vm0, %v483_v25, 1326507024 }
  0xb2   :  { %v680_v34 = vadd.s32 4294967294, %v92_v27  ;;  %v302_v48 = vsub.s32 %v298_v39, %v301_v30  ;;  %v494_v3 = vsel %vm486_vm1, %v477_v56, %v493_v61  ;;  %v488_v7 = vsel %vm484_vm14, %v468_v63, %v471_v36 }
  0xb3   :  { %v495_v8 = vsel %vm485_vm15, %v492_v58, %v494_v3  ;;  %v498_v18 = vsel %vm486_vm1, %v480_v54, %v497_v9  ;;  %v294_v27 = vadd.s32 %v864_v1, %v870_v4  ;;  %v110_v33 = vsub.s32 4, %v875_v5 }
  0xb4   :  { %vm681_vm13 = vcmp.lt.s32.totalorder %v680_v34, 0  ;;  %v304_v44 = vsub.s32 0, %v302_v48  ;;  %v499_v41 = vsel %vm485_vm15, %v496_v43, %v498_v18  ;;  %vm25_vm5 = vcmp.le.f32.partialorder %v24_v15, 0.7853982 }
  0xb5   :  { %v95_v55 = vsel %vm681_vm13, 0, %v680_v34  ;;  %v912_v39 = vmul.u32.u64.low %v889_v37, %v495_v8  ;;  %v913_v19 = vmul.u32.u64.high %v889_v37, %v495_v8, %v912_v39  ;;  %v111_v52 = vsel %vm26_vm4, %v110_v33, %v875_v5 }
  0xb6   :  { %v96_v45 = vsub.s32 32, %v95_v55  ;;  %v100_v59 = vsub.s32 4294967266, %v95_v55  ;;  %v97_v49 = vshll.u32 %v88_v16, %v95_v55  ;;  %v687_v24 = vmin.u32 %v304_v44, %v302_v48 }
  0xb7   :  { %v490_v16 = vsel %vm486_vm1, %v474_v53, %v489_v51  ;;  %v917_v22 = vmul.u32.u64.low %v889_v37, %v499_v41  ;;  %v918_v23 = vmul.u32.u64.high %v889_v37, %v499_v41, %v917_v22  ;;  %v510_v42 = vadd.s32 1, %v913_v19 }
  0xb8   :  { %v98_v47 = vshrl.u32 %v80_v46, %v96_v45  ;;  %v101_v60 = vadd.s32 127, %v100_v59  ;;  %v306_v62 = vclz %v687_v24  ;;  %v491_v30 = vsel %vm485_vm15, %v488_v7, %v490_v16 }
  0xb9   :  { %v507_v50 = vmul.u32 %v889_v37, %v491_v30  ;;  %vm509_vm3 = vc.u32 %v918_v23, %v912_v39  ;;  %v113_v55 = vsel %vm25_vm5, 0, %v111_v52  ;;  %v324_v59 = vsub.s32 4, %v885_v26 }
  0xba   :  { %v99_v0 = vor.u32 %v98_v47, %v97_v49  ;;  %v102_v2 = vshll.u32 %v101_v60, 23  ;;  %v688_v6 = vadd.s32 4294967294, %v306_v62  ;;  %v511_v31 = vsel %vm509_vm3, %v510_v42, %v913_v19 }
  0xbb   :  { %v512_v36 = vadd.s32 %v511_v31, %v507_v50  ;;  %v117_v49 = vadd.s32 3, %v113_v55  ;;  %vm240_vm6 = vcmp.lt.s32.totalorder %v794_v13, 0  ;;  %v222_v25 = vand.u32 3, %v113_v55 }
  0xbc   :  { %v103_v10 = vor.u32 4788187, %v102_v2  ;;  %v106_v11 = vcvt.s32.f32 %v99_v0  ;;  %vm689_vm2 = vcmp.lt.s32.totalorder %v688_v6, 0  ;;  %vm239_vm7 = vcmp.le.f32.partialorder %v238_v17, 0.7853982 }
  0xbd   :  { %v309_v21 = vsel %vm689_vm2, 0, %v688_v6  ;;  %v513_v37 = vadd.s32 536870912, %v512_v36  ;;  %v325_v60 = vsel %vm240_vm6, %v324_v59, %v885_v26  ;;  %v118_v58 = vand.u32 3, %v117_v49 }
  0xbe   :  { %v104_v20 = vand.u32 2147483647, %v103_v10  ;;  %v310_v28 = vsub.s32 32, %v309_v21  ;;  %v314_v29 = vsub.s32 4294967266, %v309_v21  ;;  %v311_v34 = vshll.u32 %v302_v48, %v309_v21 }
  0xbf   :  { %v934_v57 = vshrl.u32 %v513_v37, 30  ;;  %v327_v51 = vsel %vm239_vm7, 0, %v325_v60  ;;  %vm223_vm8 = vcmp.lt.s32.totalorder %v222_v25, 2  ;;  %vm224_vm9 = vcmp.eq.s32.totalorder %v222_v25, 0 }
  0xc0   :  { %v107_v32 = vmul.f32 %v106_v11, %v104_v20  ;;  %v312_v35 = vshrl.u32 %v294_v27, %v310_v28  ;;  %v315_v40 = vadd.s32 127, %v314_v29  ;;  %vm123_vm10 = vcmp.eq.s32.totalorder %v118_v58, 2 }
  0xc1   :  { %v515_v15 = vshll.u32 %v934_v57, 30  ;;  %vm227_vm11 = vcmp.eq.s32.totalorder %v222_v25, 2  ;;  %vm120_vm12 = vcmp.eq.s32.totalorder %v118_v58, 0  ;;  %v331_v7 = vadd.s32 3, %v327_v51 }
  0xc2   :  { %v108_v46 = vxor.u32 2147483648, %v107_v32  ;;  %v313_v1 = vor.u32 %v312_v35, %v311_v34  ;;  %v316_v4 = vshll.u32 %v315_v40, 23  ;;  %vm119_vm13 = vcmp.lt.s32.totalorder %v118_v58, 2 }
  0xc3   :  { %v516_v5 = vsub.s32 %v512_v36, %v515_v15  ;;  %vm116_vm14 = vweird.f32 %v792_v12  ;;  %v436_v18 = vand.u32 3, %v327_v51  ;;  %v332_v20 = vand.u32 3, %v331_v7 }
  0xc4   :  { %v109_v48 = vsel %vm26_vm4, %v108_v46, %v107_v32  ;;  %v317_v54 = vor.u32 4788187, %v316_v4  ;;  %v320_v56 = vcvt.s32.f32 %v313_v1  ;;  %v508_v22 = vadd.s32 %v912_v39, %v918_v23 }
  0xc5   :  { %v112_v53 = vsel %vm25_vm5, %v792_v12, %v109_v48  ;;  %v518_v62 = vsub.s32 0, %v516_v5  ;;  %vm438_vm0 = vcmp.eq.s32.totalorder %v436_v18, 0  ;;  %vm334_vm1 = vcmp.eq.s32.totalorder %v332_v20, 0 }
  0xc6   :  { %725 = vcosq.f32 %v112_v53  ;;  %v318_v44 = vand.u32 2147483647, %v317_v54  ;;  %vm337_vm2 = vcmp.eq.s32.totalorder %v332_v20, 2  ;;  %vm441_vm3 = vcmp.eq.s32.totalorder %v436_v18, 2 }
  0xc7   :  { %727 = vsinq.f32 %v112_v53  ;;  %v695_v0 = vmin.u32 %v518_v62, %v516_v5  ;;  %vm333_vm4 = vcmp.lt.s32.totalorder %v332_v20, 2  ;;  %vm437_vm5 = vcmp.lt.s32.totalorder %v436_v18, 2 }
  0xc8   :  { %v321_v45 = vmul.f32 %v320_v56, %v318_v44  ;;  %v538_v37 = vsub.s32 4, %v934_v57 }
  0xc9   :  { %v520_v17 = vclz %v695_v0 }
  0xca   :  { %v322_v24 = vxor.u32 2147483648, %v321_v45 }
  0xcb   :  { %v696_v10 = vadd.s32 4294967294, %v520_v17 }
  0xcc   :  { %v323_v47 = vsel %vm240_vm6, %v322_v24, %v321_v45  ;;  %vm330_vm6 = vweird.f32 %v794_v13 }
  0xcd   :  { %v326_v61 = vsel %vm239_vm7, %v794_v13, %v323_v47  ;;  %vm697_vm15 = vcmp.lt.s32.totalorder %v696_v10, 0  ;;  %vm454_vm7 = vcmp.lt.s32.totalorder %v796_v14, 0 }
  0xce   :  { %729 = vcosq.f32 %v326_v61  ;;  %v523_v21 = vsel %vm697_vm15, 0, %v696_v10  ;;  %v539_v13 = vsel %vm454_vm7, %v538_v37, %v934_v57  ;;  %vm544_vm15 = vweird.f32 %v796_v14 }
  0xcf   :  { %731 = vsinq.f32 %v326_v61  ;;  %v524_v27 = vsub.s32 32, %v523_v21  ;;  %v528_v28 = vsub.s32 4294967266, %v523_v21  ;;  %v525_v32 = vshll.u32 %v516_v5, %v523_v21 }
  0xd0   :  { %v726_v63 = vpop.eup %725 }
  0xd1   :  { %v728_v2 = vpop.eup %727  ;;  %v124_v3 = vxor.u32 2147483648, %v726_v63  ;;  %v526_v33 = vshrl.u32 %v508_v22, %v524_v27  ;;  %v529_v34 = vadd.s32 127, %v528_v28 }
  0xd2   :  { %v121_v43 = vxor.u32 2147483648, %v728_v2 }
  0xd3   :  { %v125_v6 = vsel %vm123_vm10, %v124_v3, %v728_v2  ;;  %v229_v26 = vsel %vm227_vm11, %v124_v3, %v728_v2  ;;  %v527_v46 = vor.u32 %v526_v33, %v525_v32  ;;  %v530_v50 = vshll.u32 %v529_v34, 23 }
  0xd4   :  { %v122_v8 = vsel %vm120_vm12, %v726_v63, %v121_v43  ;;  %v226_v9 = vsel %vm224_vm9, %v726_v63, %v121_v43 }
  0xd5   :  { %v126_v11 = vsel %vm119_vm13, %v122_v8, %v125_v6  ;;  %v230_v16 = vsel %vm223_vm8, %v226_v9, %v229_v26  ;;  %v531_v31 = vor.u32 4788187, %v530_v50  ;;  %v534_v53 = vcvt.s32.f32 %v527_v46 }
  0xd6   :  { %v127_v41 = vsel %vm116_vm14, nan, %v126_v11  ;;  %v231_v19 = vsel %vm116_vm14, nan, %v230_v16  ;;  %vm453_vm8 = vcmp.le.f32.partialorder %v452_v38, 0.7853982 }
  0xd7   :  { %128 = vst [vmem:[#allocation2] sm:$0x3f] %v127_v41  ;;  %232 = vst [vmem:[#allocation2 + $0x12] sm:$0x3f] %v231_v19  ;;  %v532_v36 = vand.u32 2147483647, %v531_v31 }
  0xd8   :  { %v730_v29 = vpop.eup %729  ;;  %v541_v45 = vsel %vm453_vm8, 0, %v539_v13 }
  0xd9   :  { %v732_v30 = vpop.eup %731  ;;  %v338_v12 = vxor.u32 2147483648, %v730_v29  ;;  %v535_v54 = vmul.f32 %v534_v53, %v532_v36  ;;  %v545_v59 = vadd.s32 3, %v541_v45  ;;  %v650_v15 = vand.u32 3, %v541_v45 }
  0xda   :  { %v335_v35 = vxor.u32 2147483648, %v732_v30 }
  0xdb   :  { %v339_v40 = vsel %vm337_vm2, %v338_v12, %v732_v30  ;;  %v443_v42 = vsel %vm441_vm3, %v338_v12, %v732_v30  ;;  %v536_v55 = vxor.u32 2147483648, %v535_v54  ;;  %v546_v49 = vand.u32 3, %v545_v59 }
  0xdc   :  { %v336_v1 = vsel %vm334_vm1, %v730_v29, %v335_v35  ;;  %v440_v39 = vsel %vm438_vm0, %v730_v29, %v335_v35  ;;  %vm655_vm10 = vcmp.eq.s32.totalorder %v650_v15, 2  ;;  %vm652_vm12 = vcmp.eq.s32.totalorder %v650_v15, 0 }
  0xdd   :  { %v340_v23 = vsel %vm333_vm4, %v336_v1, %v339_v40  ;;  %v444_v4 = vsel %vm437_vm5, %v440_v39, %v443_v42  ;;  %v537_v44 = vsel %vm454_vm7, %v536_v55, %v535_v54  ;;  %vm551_vm9 = vcmp.eq.s32.totalorder %v546_v49, 2 }
  0xde   :  { %v341_v48 = vsel %vm330_vm6, nan, %v340_v23  ;;  %v445_v52 = vsel %vm330_vm6, nan, %v444_v4  ;;  %v540_v56 = vsel %vm453_vm8, %v796_v14, %v537_v44  ;;  %vm548_vm11 = vcmp.eq.s32.totalorder %v546_v49, 0 }
  0xdf   :  { %342 = vst [vmem:[#allocation2 + $0x6] sm:$0x3f] %v341_v48  ;;  %446 = vst [vmem:[#allocation2 + $0x18] sm:$0x3f] %v445_v52  ;;  %733 = vcosq.f32 %v540_v56  ;;  %vm547_vm13 = vcmp.lt.s32.totalorder %v546_v49, 2  ;;  %vm651_vm14 = vcmp.lt.s32.totalorder %v650_v15, 2 }
  0xe0   :  { %735 = vsinq.f32 %v540_v56 }
  0xe9   :  { %v734_v24 = vpop.eup %733 }
  0xea   :  { %v736_v5 = vpop.eup %735  ;;  %v552_v25 = vxor.u32 2147483648, %v734_v24 }
  0xeb   :  { %v549_v47 = vxor.u32 2147483648, %v736_v5 }
  0xec   :  { %v553_v38 = vsel %vm551_vm9, %v552_v25, %v736_v5  ;;  %v657_v57 = vsel %vm655_vm10, %v552_v25, %v736_v5 }
  0xed   :  { %v550_v60 = vsel %vm548_vm11, %v734_v24, %v549_v47  ;;  %v654_v58 = vsel %vm652_vm12, %v734_v24, %v549_v47 }
  0xee   :  { %v554_v61 = vsel %vm547_vm13, %v550_v60, %v553_v38  ;;  %v658_v62 = vsel %vm651_vm14, %v654_v58, %v657_v57 }
  0xef   :  { %v555_v63 = vsel %vm544_vm15, nan, %v554_v61  ;;  %v659_v51 = vsel %vm544_vm15, nan, %v658_v62 }
  0xf0   :  { %556 = vst [vmem:[#allocation2 + $0xc] sm:$0x3f] %v555_v63  ;;  %660 = vst [vmem:[#allocation2 + $0x1e] sm:$0x3f] %v659_v51 }
  0xf1   :  { %748 = shalt.err (!%p745_p4)
}
  0xf2   :  { %s749_s16 = scalar_lea.hbm %s970_s2, 640 }
  0xf3   :  { %p750_p5 = scmp.ne.s32.totalorder %s970_s2, %s749_s16  ;;  %p753_p6 = scmp.lt.u32.totalorder %s749_s16, %s970_s2 }
  0xf5   :  { %p755_p7 = pnand %p753_p6, %p750_p5 }
  0xf7   :  { %758 = shalt.err (!%p755_p7)
}
  0xf8   :  { %s769_s21 = smov 128   ;;  %s770_s22 = smov 8  }
  0xf9   :  { %673 = dma.vmem_to_hbm [thread:$0]  %s668_s1, 640, %s970_s2, [#allocation3], %s769_s21, %s769_s21, %s770_s22  }
  0xfa   :  { %759 = dma.done.wait [#allocation3], 640  }
  0xfb   :  { %760 = vsyncadd [#allocation3], 4294966656 }
  0xfc   :  { %677 = vsyncpa [#allocation3], 1 }

</bundles_post_ra>
